<compile_context>
chip_gen: v7x
topology: tpu7x:2x2x1
jax: 0.10.0
libtpu: 0.0.40
codegen_flags: <defaults>
</compile_context>

<pallas_src>
import jax
import jax.numpy as jnp
from jax.experimental import pallas as pl
from jax.experimental.pallas import tpu as pltpu

OUT_TRUE = 12     # real fc5 width
OUT_PAD = 128     # lane-dense padded fc5 width


def _mlp_kernel(kp_ref, vel_ref,
                w1a_ref, w1b_ref, b1_ref,
                w2_ref, b2_ref,
                w3_ref, b3_ref,
                w4_ref, b4_ref,
                w5_ref, b5_ref,
                o_ref):
    """Fused forward pass: bf16 MXU matmuls, f32 accumulate / bias / ReLU."""
    bf16 = jnp.bfloat16
    kp = kp_ref[...].astype(bf16)    # (TB, 12)
    vel = vel_ref[...].astype(bf16)  # (TB, 3)

    # fc1: cat([kp, vel], axis=1) @ W1  ==  kp @ W1[:12] + vel @ W1[12:]
    h = (jnp.dot(kp, w1a_ref[...], preferred_element_type=jnp.float32)
         + jnp.dot(vel, w1b_ref[...], preferred_element_type=jnp.float32)
         + b1_ref[...])
    h = jnp.maximum(h, 0.0)                                             # (TB, 128)

    h = jnp.dot(h.astype(bf16), w2_ref[...],
                preferred_element_type=jnp.float32) + b2_ref[...]
    h = jnp.maximum(h, 0.0)                                             # (TB, 256)

    h = jnp.dot(h.astype(bf16), w3_ref[...],
                preferred_element_type=jnp.float32) + b3_ref[...]
    h = jnp.maximum(h, 0.0)                                             # (TB, 256)

    h = jnp.dot(h.astype(bf16), w4_ref[...],
                preferred_element_type=jnp.float32) + b4_ref[...]
    h = jnp.maximum(h, 0.0)                                             # (TB, 128)

    out = jnp.dot(h.astype(bf16), w5_ref[...],
                  preferred_element_type=jnp.float32) + b5_ref[...]     # no ReLU
    o_ref[...] = out.astype(o_ref.dtype)                                # (TB, 128)


def _round_up(n, m):
    return (n + m - 1) // m * m


def keypoint_regression_forward(start_kp, velocity, params, *, tb=256):
    """start_kp: (B, 12) f32, velocity: (B, 3) f32; returns (B, 12) f32."""
    B = start_kp.shape[0]
    # bf16 operands: keep the batch tile a multiple of 16 (bf16 sublane packing).
    # Default TB=256 fills the v6e/v7x 256-row MXU; tiny batches collapse to one step.
    TB = min(tb, _round_up(B, 16))
    B_pad = _round_up(B, TB)
    if B_pad != B:
        pad = ((0, B_pad - B), (0, 0))
        start_kp = jnp.pad(start_kp, pad)
        velocity = jnp.pad(velocity, pad)

    (w1a, w1b, b1), (w2, b2), (w3, b3), (w4, b4), (w5, b5) = params
    weight_operands = (w1a, w1b, b1, w2, b2, w3, b3, w4, b4, w5, b5)

    def act_spec(feat):
        return pl.BlockSpec((TB, feat), lambda i: (i, 0))

    def resident_spec(a):
        # Same block every grid step -> stays VMEM-resident, DMA'd once.
        return pl.BlockSpec(a.shape, lambda i: (0, 0))

    out = pl.pallas_call(
        _mlp_kernel,
        out_shape=jax.ShapeDtypeStruct((B_pad, OUT_PAD), jnp.float32),
        grid=(B_pad // TB,),
        in_specs=[act_spec(12), act_spec(3)]
                 + [resident_spec(a) for a in weight_operands],
        out_specs=pl.BlockSpec((TB, OUT_PAD), lambda i: (i, 0)),
        compiler_params=pltpu.CompilerParams(
            dimension_semantics=("parallel",),   # v7x: shard batch over 2 TCs
        ),
    )(start_kp, velocity, *weight_operands)

    return out[:B, :OUT_TRUE]


def init_params(key):
    """Synthetic nn.Linear-style params, pre-packed for the kernel.

    Weights stored transposed (in, out) and cast to bf16; biases kept f32.
    fc1 is split into (12,128)+(3,128) (no concat), fc5 zero-padded to 128 outs.
    Also returns the raw f32 (w, b) list for the reference check.
    """
    sizes = [(15, 128), (128, 256), (256, 256), (256, 128), (128, OUT_TRUE)]
    raw = []
    for fan_in, fan_out in sizes:
        key, kw, kb = jax.random.split(key, 3)
        bound = 1.0 / jnp.sqrt(jnp.float32(fan_in))  # torch default init scale
        w = jax.random.uniform(kw, (fan_in, fan_out), jnp.float32, -bound, bound)
        b = jax.random.uniform(kb, (1, fan_out), jnp.float32, -bound, bound)
        raw.append((w, b))

    (w1, b1), (w2, b2), (w3, b3), (w4, b4), (w5, b5) = raw
    bf16 = jnp.bfloat16
    w1a = w1[:12].astype(bf16)            # (12, 128)
    w1b = w1[12:].astype(bf16)            # (3, 128)
    w5p = jnp.zeros((128, OUT_PAD), jnp.float32).at[:, :OUT_TRUE].set(w5).astype(bf16)
    b5p = jnp.zeros((1, OUT_PAD), jnp.float32).at[:, :OUT_TRUE].set(b5)

    params = ((w1a, w1b, b1),
              (w2.astype(bf16), b2),
              (w3.astype(bf16), b3),
              (w4.astype(bf16), b4),
              (w5p, b5p))
    return params, raw


def reference_forward(start_kp, velocity, raw_params):
    """Pure-JAX reference with matching precision (bf16 weights, f32 accum)."""
    x = jnp.concatenate([start_kp, velocity], axis=1)
    bf16 = jnp.bfloat16

    def lin(x, w, b, relu):
        y = jnp.dot(x.astype(bf16), w.astype(bf16),
                    preferred_element_type=jnp.float32) + b
        return jnp.maximum(y, 0.0) if relu else y

    (w1, b1), (w2, b2), (w3, b3), (w4, b4), (w5, b5) = raw_params
    h = lin(x, w1, b1, True)
    h = lin(h, w2, b2, True)
    h = lin(h, w3, b3, True)
    h = lin(h, w4, b4, True)
    return lin(h, w5, b5, False)


if __name__ == "__main__":
    key = jax.random.PRNGKey(0)
    key, k_kp, k_vel = jax.random.split(key, 3)

    B = 8
    start_kp = jax.random.normal(k_kp, (B, 12), jnp.float32)   # 6 keypoints * (x, y)
    velocity = jax.random.normal(k_vel, (B, 3), jnp.float32)   # joint velocity command

    params, raw_params = init_params(key)

    out = keypoint_regression_forward(start_kp, velocity, params)
    jax.block_until_ready(out)

    assert out.shape == (B, OUT_TRUE) and out.dtype == jnp.float32

    ref = reference_forward(start_kp, velocity, raw_params)
    max_err = float(jnp.max(jnp.abs(out - ref)))
    assert jnp.allclose(out, ref, atol=2e-2, rtol=2e-2), f"max abs err {max_err}"

    print("KERNEL_OK")
</pallas_src>

<mosaic_0001>
module attributes {stable_mosaic.version = 11 : i64} {
  func.func @_mlp_kernel(%arg0: i32, %arg1: memref<16x12xf32, #tpu.memory_space<vmem>>, %arg2: memref<16x3xf32, #tpu.memory_space<vmem>>, %arg3: memref<12x128xbf16, #tpu.memory_space<vmem>>, %arg4: memref<3x128xbf16, #tpu.memory_space<vmem>>, %arg5: memref<1x128xf32, #tpu.memory_space<vmem>>, %arg6: memref<128x256xbf16, #tpu.memory_space<vmem>>, %arg7: memref<1x256xf32, #tpu.memory_space<vmem>>, %arg8: memref<256x256xbf16, #tpu.memory_space<vmem>>, %arg9: memref<1x256xf32, #tpu.memory_space<vmem>>, %arg10: memref<256x128xbf16, #tpu.memory_space<vmem>>, %arg11: memref<1x128xf32, #tpu.memory_space<vmem>>, %arg12: memref<128x128xbf16, #tpu.memory_space<vmem>>, %arg13: memref<1x128xf32, #tpu.memory_space<vmem>>, %arg14: memref<16x128xf32, #tpu.memory_space<vmem>>) attributes {dimension_semantics = [#tpu.dimension_semantics<parallel>], iteration_bounds = array<i64: 1>, scalar_prefetch = 0 : i64, scratch_operands = 0 : i64, tpu.core_type = #tpu.core_type<tc>, window_params = [{transform_indices = @transform_0, window_bounds = array<i64: 16, 12>}, {transform_indices = @transform_1, window_bounds = array<i64: 16, 3>}, {pipeline_mode = #tpu.pipeline_mode<synchronous>, transform_indices = @transform_2, window_bounds = array<i64: 12, 128>}, {pipeline_mode = #tpu.pipeline_mode<synchronous>, transform_indices = @transform_3, window_bounds = array<i64: 3, 128>}, {pipeline_mode = #tpu.pipeline_mode<synchronous>, transform_indices = @transform_4, window_bounds = array<i64: 1, 128>}, {pipeline_mode = #tpu.pipeline_mode<synchronous>, transform_indices = @transform_5, window_bounds = array<i64: 128, 256>}, {pipeline_mode = #tpu.pipeline_mode<synchronous>, transform_indices = @transform_6, window_bounds = array<i64: 1, 256>}, {pipeline_mode = #tpu.pipeline_mode<synchronous>, transform_indices = @transform_7, window_bounds = array<i64: 256, 256>}, {pipeline_mode = #tpu.pipeline_mode<synchronous>, transform_indices = @transform_8, window_bounds = array<i64: 1, 256>}, {pipeline_mode = #tpu.pipeline_mode<synchronous>, transform_indices = @transform_9, window_bounds = array<i64: 256, 128>}, {pipeline_mode = #tpu.pipeline_mode<synchronous>, transform_indices = @transform_10, window_bounds = array<i64: 1, 128>}, {pipeline_mode = #tpu.pipeline_mode<synchronous>, transform_indices = @transform_11, window_bounds = array<i64: 128, 128>}, {pipeline_mode = #tpu.pipeline_mode<synchronous>, transform_indices = @transform_12, window_bounds = array<i64: 1, 128>}, {transform_indices = @transform_13, window_bounds = array<i64: 16, 128>}]} {
    %c0 = arith.constant 0 : index
    %c0_0 = arith.constant 0 : index
    %0 = vector.load %arg1[%c0, %c0_0] : memref<16x12xf32, #tpu.memory_space<vmem>>, vector<16x12xf32>
    %1 = arith.truncf %0 : vector<16x12xf32> to vector<16x12xbf16>
    %c0_1 = arith.constant 0 : index
    %c0_2 = arith.constant 0 : index
    %2 = vector.load %arg2[%c0_1, %c0_2] : memref<16x3xf32, #tpu.memory_space<vmem>>, vector<16x3xf32>
    %3 = arith.truncf %2 : vector<16x3xf32> to vector<16x3xbf16>
    %c0_3 = arith.constant 0 : index
    %c0_4 = arith.constant 0 : index
    %4 = vector.load %arg3[%c0_3, %c0_4] : memref<12x128xbf16, #tpu.memory_space<vmem>>, vector<12x128xbf16>
    %cst = arith.constant dense<0.000000e+00> : vector<16x128xf32>
    %5 = tpu.matmul %1, %4, %cst {dimension_numbers = #tpu.dot_dimension_numbers<[1], [0], [0], [1], [0, 0, 1, 1], [], []>} : vector<16x12xbf16>, vector<12x128xbf16>, vector<16x128xf32> -> vector<16x128xf32>
    %c0_5 = arith.constant 0 : index
    %c0_6 = arith.constant 0 : index
    %6 = vector.load %arg4[%c0_5, %c0_6] : memref<3x128xbf16, #tpu.memory_space<vmem>>, vector<3x128xbf16>
    %cst_7 = arith.constant dense<0.000000e+00> : vector<16x128xf32>
    %7 = tpu.matmul %3, %6, %cst_7 {dimension_numbers = #tpu.dot_dimension_numbers<[1], [0], [0], [1], [0, 0, 1, 1], [], []>} : vector<16x3xbf16>, vector<3x128xbf16>, vector<16x128xf32> -> vector<16x128xf32>
    %8 = arith.addf %5, %7 : vector<16x128xf32>
    %c0_8 = arith.constant 0 : index
    %c0_9 = arith.constant 0 : index
    %9 = vector.load %arg5[%c0_8, %c0_9] : memref<1x128xf32, #tpu.memory_space<vmem>>, vector<1x128xf32>
    %10 = vector.broadcast %9 : vector<1x128xf32> to vector<16x128xf32>
    %11 = arith.addf %8, %10 : vector<16x128xf32>
    %cst_10 = arith.constant 0.000000e+00 : f32
    %12 = vector.broadcast %cst_10 : f32 to vector<16x128xf32>
    %13 = arith.maximumf %11, %12 : vector<16x128xf32>
    %14 = arith.truncf %13 : vector<16x128xf32> to vector<16x128xbf16>
    %c0_11 = arith.constant 0 : index
    %c0_12 = arith.constant 0 : index
    %15 = vector.load %arg6[%c0_11, %c0_12] : memref<128x256xbf16, #tpu.memory_space<vmem>>, vector<128x256xbf16>
    %cst_13 = arith.constant dense<0.000000e+00> : vector<16x256xf32>
    %16 = tpu.matmul %14, %15, %cst_13 {dimension_numbers = #tpu.dot_dimension_numbers<[1], [0], [0], [1], [0, 0, 1, 1], [], []>} : vector<16x128xbf16>, vector<128x256xbf16>, vector<16x256xf32> -> vector<16x256xf32>
    %c0_14 = arith.constant 0 : index
    %c0_15 = arith.constant 0 : index
    %17 = vector.load %arg7[%c0_14, %c0_15] : memref<1x256xf32, #tpu.memory_space<vmem>>, vector<1x256xf32>
    %18 = vector.broadcast %17 : vector<1x256xf32> to vector<16x256xf32>
    %19 = arith.addf %16, %18 : vector<16x256xf32>
    %cst_16 = arith.constant 0.000000e+00 : f32
    %20 = vector.broadcast %cst_16 : f32 to vector<16x256xf32>
    %21 = arith.maximumf %19, %20 : vector<16x256xf32>
    %22 = arith.truncf %21 : vector<16x256xf32> to vector<16x256xbf16>
    %c0_17 = arith.constant 0 : index
    %c0_18 = arith.constant 0 : index
    %23 = vector.load %arg8[%c0_17, %c0_18] : memref<256x256xbf16, #tpu.memory_space<vmem>>, vector<256x256xbf16>
    %cst_19 = arith.constant dense<0.000000e+00> : vector<16x256xf32>
    %24 = tpu.matmul %22, %23, %cst_19 {dimension_numbers = #tpu.dot_dimension_numbers<[1], [0], [0], [1], [0, 0, 1, 1], [], []>} : vector<16x256xbf16>, vector<256x256xbf16>, vector<16x256xf32> -> vector<16x256xf32>
    %c0_20 = arith.constant 0 : index
    %c0_21 = arith.constant 0 : index
    %25 = vector.load %arg9[%c0_20, %c0_21] : memref<1x256xf32, #tpu.memory_space<vmem>>, vector<1x256xf32>
    %26 = vector.broadcast %25 : vector<1x256xf32> to vector<16x256xf32>
    %27 = arith.addf %24, %26 : vector<16x256xf32>
    %cst_22 = arith.constant 0.000000e+00 : f32
    %28 = vector.broadcast %cst_22 : f32 to vector<16x256xf32>
    %29 = arith.maximumf %27, %28 : vector<16x256xf32>
    %30 = arith.truncf %29 : vector<16x256xf32> to vector<16x256xbf16>
    %c0_23 = arith.constant 0 : index
    %c0_24 = arith.constant 0 : index
    %31 = vector.load %arg10[%c0_23, %c0_24] : memref<256x128xbf16, #tpu.memory_space<vmem>>, vector<256x128xbf16>
    %cst_25 = arith.constant dense<0.000000e+00> : vector<16x128xf32>
    %32 = tpu.matmul %30, %31, %cst_25 {dimension_numbers = #tpu.dot_dimension_numbers<[1], [0], [0], [1], [0, 0, 1, 1], [], []>} : vector<16x256xbf16>, vector<256x128xbf16>, vector<16x128xf32> -> vector<16x128xf32>
    %c0_26 = arith.constant 0 : index
    %c0_27 = arith.constant 0 : index
    %33 = vector.load %arg11[%c0_26, %c0_27] : memref<1x128xf32, #tpu.memory_space<vmem>>, vector<1x128xf32>
    %34 = vector.broadcast %33 : vector<1x128xf32> to vector<16x128xf32>
    %35 = arith.addf %32, %34 : vector<16x128xf32>
    %cst_28 = arith.constant 0.000000e+00 : f32
    %36 = vector.broadcast %cst_28 : f32 to vector<16x128xf32>
    %37 = arith.maximumf %35, %36 : vector<16x128xf32>
    %38 = arith.truncf %37 : vector<16x128xf32> to vector<16x128xbf16>
    %c0_29 = arith.constant 0 : index
    %c0_30 = arith.constant 0 : index
    %39 = vector.load %arg12[%c0_29, %c0_30] : memref<128x128xbf16, #tpu.memory_space<vmem>>, vector<128x128xbf16>
    %cst_31 = arith.constant dense<0.000000e+00> : vector<16x128xf32>
    %40 = tpu.matmul %38, %39, %cst_31 {dimension_numbers = #tpu.dot_dimension_numbers<[1], [0], [0], [1], [0, 0, 1, 1], [], []>} : vector<16x128xbf16>, vector<128x128xbf16>, vector<16x128xf32> -> vector<16x128xf32>
    %c0_32 = arith.constant 0 : index
    %c0_33 = arith.constant 0 : index
    %41 = vector.load %arg13[%c0_32, %c0_33] : memref<1x128xf32, #tpu.memory_space<vmem>>, vector<1x128xf32>
    %42 = vector.broadcast %41 : vector<1x128xf32> to vector<16x128xf32>
    %43 = arith.addf %40, %42 : vector<16x128xf32>
    %c0_34 = arith.constant 0 : index
    %c0_35 = arith.constant 0 : index
    %44 = vector.load %arg14[%c0_34, %c0_35] : memref<16x128xf32, #tpu.memory_space<vmem>>, vector<16x128xf32>
    tpu.vector_store %arg14[%c0_34, %c0_35], %43 {strides = array<i32>} : memref<16x128xf32, #tpu.memory_space<vmem>>, vector<16x128xf32>,
    return
  }
  func.func @transform_0(%arg0: i32) -> (i32, i32) {
    %c0_i32 = arith.constant 0 : i32
    %c0_i32_0 = arith.constant 0 : i32
    return %arg0, %c0_i32 : i32, i32
  }
  func.func @transform_1(%arg0: i32) -> (i32, i32) {
    %c0_i32 = arith.constant 0 : i32
    %c0_i32_0 = arith.constant 0 : i32
    return %arg0, %c0_i32 : i32, i32
  }
  func.func @transform_2(%arg0: i32) -> (i32, i32) {
    %c0_i32 = arith.constant 0 : i32
    %c0_i32_0 = arith.constant 0 : i32
    %c0_i32_1 = arith.constant 0 : i32
    return %c0_i32, %c0_i32_0 : i32, i32
  }
  func.func @transform_3(%arg0: i32) -> (i32, i32) {
    %c0_i32 = arith.constant 0 : i32
    %c0_i32_0 = arith.constant 0 : i32
    %c0_i32_1 = arith.constant 0 : i32
    return %c0_i32, %c0_i32_0 : i32, i32
  }
  func.func @transform_4(%arg0: i32) -> (i32, i32) {
    %c0_i32 = arith.constant 0 : i32
    %c0_i32_0 = arith.constant 0 : i32
    %c0_i32_1 = arith.constant 0 : i32
    return %c0_i32, %c0_i32_0 : i32, i32
  }
  func.func @transform_5(%arg0: i32) -> (i32, i32) {
    %c0_i32 = arith.constant 0 : i32
    %c0_i32_0 = arith.constant 0 : i32
    %c0_i32_1 = arith.constant 0 : i32
    return %c0_i32, %c0_i32_0 : i32, i32
  }
  func.func @transform_6(%arg0: i32) -> (i32, i32) {
    %c0_i32 = arith.constant 0 : i32
    %c0_i32_0 = arith.constant 0 : i32
    %c0_i32_1 = arith.constant 0 : i32
    return %c0_i32, %c0_i32_0 : i32, i32
  }
  func.func @transform_7(%arg0: i32) -> (i32, i32) {
    %c0_i32 = arith.constant 0 : i32
    %c0_i32_0 = arith.constant 0 : i32
    %c0_i32_1 = arith.constant 0 : i32
    return %c0_i32, %c0_i32_0 : i32, i32
  }
  func.func @transform_8(%arg0: i32) -> (i32, i32) {
    %c0_i32 = arith.constant 0 : i32
    %c0_i32_0 = arith.constant 0 : i32
    %c0_i32_1 = arith.constant 0 : i32
    return %c0_i32, %c0_i32_0 : i32, i32
  }
  func.func @transform_9(%arg0: i32) -> (i32, i32) {
    %c0_i32 = arith.constant 0 : i32
    %c0_i32_0 = arith.constant 0 : i32
    %c0_i32_1 = arith.constant 0 : i32
    return %c0_i32, %c0_i32_0 : i32, i32
  }
  func.func @transform_10(%arg0: i32) -> (i32, i32) {
    %c0_i32 = arith.constant 0 : i32
    %c0_i32_0 = arith.constant 0 : i32
    %c0_i32_1 = arith.constant 0 : i32
    return %c0_i32, %c0_i32_0 : i32, i32
  }
  func.func @transform_11(%arg0: i32) -> (i32, i32) {
    %c0_i32 = arith.constant 0 : i32
    %c0_i32_0 = arith.constant 0 : i32
    %c0_i32_1 = arith.constant 0 : i32
    return %c0_i32, %c0_i32_0 : i32, i32
  }
  func.func @transform_12(%arg0: i32) -> (i32, i32) {
    %c0_i32 = arith.constant 0 : i32
    %c0_i32_0 = arith.constant 0 : i32
    %c0_i32_1 = arith.constant 0 : i32
    return %c0_i32, %c0_i32_0 : i32, i32
  }
  func.func @transform_13(%arg0: i32) -> (i32, i32) {
    %c0_i32 = arith.constant 0 : i32
    %c0_i32_0 = arith.constant 0 : i32
    return %arg0, %c0_i32 : i32, i32
  }
}

</mosaic_0001>

<bundles_post_ra>
// kernel: tpu_custom_call.1
= control target key start
LH: loop header
LB: loop body
LE: loop exit
PB: predicated region body
PF: predicated region fallthrough
CT: control target
= control target key end

     0   :  { %18 = vsyncpa [#allocation3], 0  ;;  %s1531_s0 = inlined_call_operand.vmem [shape: f32[16,12], index: 0, kind: input, shape index: {}]   ;;  %s1532_s1 = inlined_call_operand.vmem [shape: f32[16,3], index: 1, kind: input, shape index: {}]   ;;  %s1533_s2 = inlined_call_operand.vmem [shape: bf16[12,128], index: 2, kind: input, shape index: {}]   ;;  %s1534_s3 = inlined_call_operand.vmem [shape: bf16[3,128], index: 3, kind: input, shape index: {}]   ;;  %s1535_s4 = inlined_call_operand.vmem [shape: f32[1,128], index: 4, kind: input, shape index: {}]   ;;  %s1536_s5 = inlined_call_operand.hbm [shape: bf16[128,256], index: 5, kind: input, shape index: {}]   ;;  %s1537_s6 = inlined_call_operand.vmem [shape: f32[1,256], index: 6, kind: input, shape index: {}]   ;;  %s1538_s7 = inlined_call_operand.hbm [shape: bf16[256,256], index: 7, kind: input, shape index: {}]   ;;  %s1539_s8 = inlined_call_operand.vmem [shape: f32[1,256], index: 8, kind: input, shape index: {}]   ;;  %s1540_s9 = inlined_call_operand.hbm [shape: bf16[256,128], index: 9, kind: input, shape index: {}]   ;;  %s1541_s10 = inlined_call_operand.vmem [shape: f32[1,128], index: 10, kind: input, shape index: {}]   ;;  %s1542_s11 = inlined_call_operand.hbm [shape: bf16[128,128], index: 11, kind: input, shape index: {}]   ;;  %s1543_s12 = inlined_call_operand.vmem [shape: f32[1,128], index: 12, kind: input, shape index: {}]   ;;  %s1544_s13 = inlined_call_operand.hbm [shape: f32[16,128], index: 13, kind: output, shape index: {}]  }
   0x1   :  { %19 = vsyncpa [#allocation6], 0 }
   0x2   :  { %20 = vsyncpa [#allocation9], 0 }
   0x3   :  { %21 = vsyncpa [#allocation4], 0  ;;  %s1323_s25 = smov [#allocation5]   ;;  %s1324_s27 = smov [#allocation2]  }
   0x4   :  { %s51_s26 = sshll.u32 %s1323_s25, 4  ;;  %s37_s28 = sshll.u32 %s1324_s27, 4  ;;  %s52_s26 = int_to_ptr.vmem [resolvable:$true] %s51_s26  ;;  %s1406_s28 = int_to_ptr.vmem [resolvable:$true] %s37_s28 }
   0x5   :  { %s1205_s14 = scalar_lea.hbm %s1538_s7, 4096 }
   0x6   :  { %p1206_p0 = scmp.ne.s32.totalorder %s1538_s7, %s1205_s14  ;;  %p1209_p1 = scmp.lt.u32.totalorder %s1205_s14, %s1538_s7 }
   0x8   :  { %p1211_p2 = pnand %p1209_p1, %p1206_p0 }
   0xa   :  { %1214 = shalt.err (!%p1211_p2)
}
   0xb   :  { %s1215_s19 = scalar_lea.vmem %s52_s26, 4096  ;;  %p1220_p4 = scmp.lt.s32.totalorder %s52_s26, %s52_s26 }
   0xc   :  { %p1216_p3 = scmp.ne.s32.totalorder %s52_s26, %s1215_s19  ;;  %p1221_p5 = scmp.lt.s32.totalorder %s1215_s19, %s1215_s19 }
   0xe   :  { %p1222_p6 = por %p1221_p5, %p1220_p4 }
  0x10   :  { %p1223_p7 = pnand %p1222_p6, %p1216_p3 }
  0x12   :  { %1226 = shalt.err (!%p1223_p7)
}
  0x13   :  { %s1325_s20 = smov 128   ;;  %s1326_s21 = smov 8  }
  0x14   :  { %57 = dma.hbm_to_vmem [thread:$0]  %s1538_s7, 4096, %s52_s26, [#allocation6], %s1325_s20, %s1325_s20, %s1326_s21  }
  0x15   :  { %s1227_s27 = scalar_lea.hbm %s1536_s5, 2048 }
  0x16   :  { %p1228_p8 = scmp.ne.s32.totalorder %s1536_s5, %s1227_s27  ;;  %p1231_p9 = scmp.lt.u32.totalorder %s1227_s27, %s1536_s5 }
  0x18   :  { %p1233_p10 = pnand %p1231_p9, %p1228_p8 }
  0x1a   :  { %1236 = shalt.err (!%p1233_p10)
}
  0x1b   :  { %s1237_s16 = scalar_lea.vmem %s1406_s28, 2048  ;;  %p1242_p12 = scmp.lt.s32.totalorder %s1406_s28, %s1406_s28 }
  0x1c   :  { %p1238_p11 = scmp.ne.s32.totalorder %s1406_s28, %s1237_s16  ;;  %p1243_p13 = scmp.lt.s32.totalorder %s1237_s16, %s1237_s16 }
  0x1e   :  { %p1244_p0 = por %p1243_p13, %p1242_p12 }
  0x20   :  { %p1245_p1 = pnand %p1244_p0, %p1238_p11 }
  0x22   :  { %1248 = shalt.err (!%p1245_p1)
}
  0x23   :  { %43 = dma.hbm_to_vmem [thread:$0]  %s1536_s5, 2048, %s1406_s28, [#allocation3], %s1325_s20, %s1325_s20, %s1326_s21  }
  0x24   :  { %s1327_s17 = smov [#allocation7]   ;;  %s1249_s23 = scalar_lea.hbm %s1540_s9, 2048 }
  0x25   :  { %s65_s18 = sshll.u32 %s1327_s17, 4  ;;  %p1250_p2 = scmp.ne.s32.totalorder %s1540_s9, %s1249_s23  ;;  %s66_s18 = int_to_ptr.vmem [resolvable:$true] %s65_s18 }
  0x26   :  { %p1253_p3 = scmp.lt.u32.totalorder %s1249_s23, %s1540_s9 }
  0x28   :  { %p1255_p4 = pnand %p1253_p3, %p1250_p2 }
  0x2a   :  { %1258 = shalt.err (!%p1255_p4)
}
  0x2b   :  { %s1259_s30 = scalar_lea.vmem %s66_s18, 2048  ;;  %p1264_p6 = scmp.lt.s32.totalorder %s66_s18, %s66_s18 }
  0x2c   :  { %p1260_p5 = scmp.ne.s32.totalorder %s66_s18, %s1259_s30  ;;  %p1265_p7 = scmp.lt.s32.totalorder %s1259_s30, %s1259_s30 }
  0x2e   :  { %p1266_p8 = por %p1265_p7, %p1264_p6 }
  0x30   :  { %p1267_p9 = pnand %p1266_p8, %p1260_p5 }
  0x32   :  { %1270 = shalt.err (!%p1267_p9)
}
  0x33   :  { %s1328_s5 = smov 64   ;;  %s1329_s28 = smov 4  }
  0x34   :  { %71 = dma.hbm_to_vmem [thread:$0]  %s1540_s9, 2048, %s66_s18, [#allocation6], %s1328_s5, %s1328_s5, %s1329_s28  }
  0x35   :  { %s1330_s16 = smov [#allocation8]   ;;  %s1271_s19 = scalar_lea.hbm %s1542_s11, 1024 }
  0x36   :  { %s79_s7 = sshll.u32 %s1330_s16, 4  ;;  %p1272_p10 = scmp.ne.s32.totalorder %s1542_s11, %s1271_s19  ;;  %s80_s7 = int_to_ptr.vmem [resolvable:$true] %s79_s7 }
  0x37   :  { %p1275_p11 = scmp.lt.u32.totalorder %s1271_s19, %s1542_s11 }
  0x39   :  { %p1277_p12 = pnand %p1275_p11, %p1272_p10 }
  0x3b   :  { %1280 = shalt.err (!%p1277_p12)
}
  0x3c   :  { %s1281_s27 = scalar_lea.vmem %s80_s7, 1024  ;;  %p1286_p0 = scmp.lt.s32.totalorder %s80_s7, %s80_s7 }
  0x3d   :  { %p1282_p13 = scmp.ne.s32.totalorder %s80_s7, %s1281_s27  ;;  %p1287_p1 = scmp.lt.s32.totalorder %s1281_s27, %s1281_s27 }
  0x3f   :  { %p1288_p2 = por %p1287_p1, %p1286_p0 }
  0x41   :  { %p1289_p3 = pnand %p1288_p2, %p1282_p13 }
  0x43   :  { %1292 = shalt.err (!%p1289_p3)
}
  0x44   :  { %85 = dma.hbm_to_vmem [thread:$0]  %s1542_s11, 1024, %s80_s7, [#allocation9], %s1328_s5, %s1328_s5, %s1329_s28  }
  0x45   :  { %1315 = dma.done.wait [#allocation3], 2048  }
  0x46   :  { %1316 = vsyncadd [#allocation3], 4294965248 }
  0x47   :  { %1317 = dma.done.wait [#allocation6], 6144  }
  0x48   :  { %1318 = vsyncadd [#allocation6], 4294961152 }
  0x49   :  { %1319 = dma.done.wait [#allocation9], 1024  }
  0x4a   :  { %1320 = vsyncadd [#allocation9], 4294966272  ;;  %vm114_vm0 = vcmask 1040384   ;;  %v1331_v0 = vmov 0.0   ;;  %vm115_vm1 = vcmask 1041408   ;;  %v1332_v1 = vmov 65535  }
  0x4b   :  { %1063 = vmatprep.subr.bf16.mxu1 %v1331_v0  ;;  %v116_v2 = vsel %vm114_vm0, 4294967295, %v1332_v1  ;;  %vm1333_vm2 = vmmov 0   ;;  %v109_v4 = vld [vmem:[%s1534_s3] sm:$0x3]  ;;  %v105_v6 = vld [vmem:[%s1532_s1 + $0x8] sm:$0xff]  ;;  %vm171_vm3 = vcmask 1045504  }
  0x4c   :  { %1065 = vmatprep.mubr.msk.bf16.mxu1 %vm1333_vm2, %v1331_v0  ;;  %v117_v3 = vsel %vm115_vm1, %v116_v2, 0  ;;  %v104_v5 = vld [vmem:[%s1532_s1] sm:$0xff]  ;;  %vm110_vm4 = vcmask 23552   ;;  %v1112_v13 = vld [vmem:[#allocation2 + $0x14] ss:$8 sps:$4 sm:$0xff]   ;;  %v102_v15 = vld [vmem:[%s1531_s0 + $0x8] sm:$0xff] }
  0x4d   :  { %v119_v7 = vand.u32 %v117_v3, %v109_v4  ;;  %v1108_v8 = vld [vmem:[%s1533_s2] sm:$0x3f]   ;;  %v106_v9 = vpack.c.bf16 %v105_v6, %v104_v5  ;;  %v1114_v16 = vld [vmem:[#allocation2 + $0x10] ss:$8 sps:$4 sm:$0xff]   ;;  %v1118_v19 = vld [vmem:[#allocation2 + $0x34] ss:$8 sps:$4 sm:$0xff]  }
  0x4e   :  { %v1109_v10 = vld [vmem:[#allocation2 + $0x4] ss:$8 sps:$4 sm:$0xff]   ;;  %v1111_v11 = vld [vmem:[#allocation2] ss:$8 sps:$4 sm:$0xff]   ;;  %v173_v12 = vsel %vm171_vm3, %v1108_v8, 0  ;;  %vm167_vm5 = vcmask 97280  }
  0x4f   :  { %1064 = vmatpush3.bf16.msra.mxu1 %v119_v7  ;;  %v101_v14 = vld [vmem:[%s1531_s0] sm:$0xff]  ;;  %336 = vmatprep.subr.bf16.mxu0 %v1109_v10  ;;  %v1120_v21 = vld [vmem:[#allocation2 + $0x30] ss:$8 sps:$4 sm:$0xff]   ;;  %v1124_v24 = vld [vmem:[#allocation2 + $0x54] ss:$8 sps:$4 sm:$0xff]   ;;  %v1334_v30 = vmov 0  }
  0x50   :  { %1069 = vmatprep.subr.bf16.mxu1 %v1331_v0  ;;  %337 = vmatpush1.bf16.msra.mxu0 %v1111_v11  ;;  %v1115_v17 = vld [vmem:[#allocation2 + $0x24] ss:$8 sps:$4 sm:$0xff]   ;;  %v1117_v18 = vld [vmem:[#allocation2 + $0x20] ss:$8 sps:$4 sm:$0xff]   ;;  %v103_v20 = vpack.c.bf16 %v102_v15, %v101_v14  ;;  %v1126_v25 = vld [vmem:[#allocation2 + $0x50] ss:$8 sps:$4 sm:$0xff]  }
  0x51   :  { %338 = vmatprep.subr.bf16.mxu0 %v1112_v13  ;;  %v1121_v22 = vld [vmem:[#allocation2 + $0x44] ss:$8 sps:$4 sm:$0xff]   ;;  %v1123_v23 = vld [vmem:[#allocation2 + $0x40] ss:$8 sps:$4 sm:$0xff]   ;;  %v1130_v28 = vld [vmem:[#allocation2 + $0x74] ss:$8 sps:$4 sm:$0xff]   ;;  %368 = vmatprep.mubr.bf16.mxu0 %v1334_v30 }
  0x52   :  { %1066 = vmatmul.mubr.msk.bf16.vlgmr.msra.gmra.mrb[0].mxu1 %vm110_vm4, %v106_v9  ;;  %v1127_v26 = vld [vmem:[#allocation2 + $0x64] ss:$8 sps:$4 sm:$0xff]   ;;  %v1129_v27 = vld [vmem:[#allocation2 + $0x60] ss:$8 sps:$4 sm:$0xff]   ;;  %v1132_v29 = vld [vmem:[#allocation2 + $0x70] ss:$8 sps:$4 sm:$0xff]  }
  0x53   :  { %1070 = vmatpush3.bf16.msra.mxu1 %v173_v12  ;;  %1071 = vmatprep.mubr.msk.bf16.mxu1 %vm1333_vm2, %v1331_v0  ;;  %v1133_v31 = vld [vmem:[#allocation5] ss:$8 sps:$4 sm:$0xff]   ;;  %v1135_v32 = vld [vmem:[#allocation5 + $0x4] ss:$8 sps:$4 sm:$0xff]   ;;  %v1138_v33 = vld [vmem:[#allocation5 + $0x14] ss:$8 sps:$4 sm:$0xff]  }
  0x54   :  { %339 = vmatpush1.bf16.msra.mxu0 %v1114_v16  ;;  %589 = vmatprep.subr.bf16.mxu1 %v1135_v32  ;;  %v1136_v34 = vld [vmem:[#allocation5 + $0x10] ss:$8 sps:$4 sm:$0xff]   ;;  %v1141_v35 = vld [vmem:[#allocation5 + $0x24] ss:$8 sps:$4 sm:$0xff]   ;;  %v1139_v36 = vld [vmem:[#allocation5 + $0x20] ss:$8 sps:$4 sm:$0xff]  }
  0x55   :  { %340 = vmatprep.subr.bf16.mxu0 %v1115_v17  ;;  %v1144_v37 = vld [vmem:[#allocation5 + $0x34] ss:$8 sps:$4 sm:$0xff]   ;;  %v1142_v38 = vld [vmem:[#allocation5 + $0x30] ss:$8 sps:$4 sm:$0xff]   ;;  %v1147_v39 = vld [vmem:[#allocation5 + $0x44] ss:$8 sps:$4 sm:$0xff]  }
  0x56   :  { %v1145_v40 = vld [vmem:[#allocation5 + $0x40] ss:$8 sps:$4 sm:$0xff]   ;;  %v1150_v41 = vld [vmem:[#allocation5 + $0x54] ss:$8 sps:$4 sm:$0xff]   ;;  %v1148_v42 = vld [vmem:[#allocation5 + $0x50] ss:$8 sps:$4 sm:$0xff]  }
  0x57   :  { %v1153_v43 = vld [vmem:[#allocation5 + $0x64] ss:$8 sps:$4 sm:$0xff]   ;;  %v1151_v44 = vld [vmem:[#allocation5 + $0x60] ss:$8 sps:$4 sm:$0xff]   ;;  %v1156_v45 = vld [vmem:[#allocation5 + $0x74] ss:$8 sps:$4 sm:$0xff]  }
  0x58   :  { %341 = vmatpush1.bf16.msra.mxu0 %v1117_v18  ;;  %v1154_v46 = vld [vmem:[#allocation5 + $0x70] ss:$8 sps:$4 sm:$0xff]   ;;  %v1159_v47 = vld [vmem:[#allocation5 + $0x84] ss:$8 sps:$4 sm:$0xff]   ;;  %v1157_v48 = vld [vmem:[#allocation5 + $0x80] ss:$8 sps:$4 sm:$0xff]  }
  0x59   :  { %342 = vmatprep.subr.bf16.mxu0 %v1118_v19  ;;  %v1162_v49 = vld [vmem:[#allocation5 + $0x94] ss:$8 sps:$4 sm:$0xff]   ;;  %v1160_v50 = vld [vmem:[#allocation5 + $0x90] ss:$8 sps:$4 sm:$0xff]   ;;  %v1165_v51 = vld [vmem:[#allocation5 + $0xa4] ss:$8 sps:$4 sm:$0xff]  }
  0x5a   :  { %1072 = vmatmul.mubr.msk.bf16.vlgmr.msra.gmra.mrb[4].mxu1 %vm167_vm5, %v103_v20  ;;  %v1163_v52 = vld [vmem:[#allocation5 + $0xa0] ss:$8 sps:$4 sm:$0xff]   ;;  %v1168_v53 = vld [vmem:[#allocation5 + $0xb4] ss:$8 sps:$4 sm:$0xff]   ;;  %v1166_v54 = vld [vmem:[#allocation5 + $0xb0] ss:$8 sps:$4 sm:$0xff]  }
  0x5b   :  { %590 = vmatpush1.bf16.msra.mxu1 %v1133_v31  ;;  %v1171_v55 = vld [vmem:[#allocation5 + $0xc4] ss:$8 sps:$4 sm:$0xff]   ;;  %v1169_v56 = vld [vmem:[#allocation5 + $0xc0] ss:$8 sps:$4 sm:$0xff]   ;;  %v1174_v57 = vld [vmem:[#allocation5 + $0xd4] ss:$8 sps:$4 sm:$0xff]  }
  0x5c   :  { %343 = vmatpush1.bf16.msra.mxu0 %v1120_v21  ;;  %591 = vmatprep.subr.bf16.mxu1 %v1138_v33  ;;  %v1172_v58 = vld [vmem:[#allocation5 + $0xd0] ss:$8 sps:$4 sm:$0xff]   ;;  %v953_v1 = vld [vmem:[%s1535_s4] ss:$0 sm:$0xff]  ;;  %v1177_v12 = vld [vmem:[#allocation5 + $0xe4] ss:$8 sps:$4 sm:$0xff]  }
  0x5d   :  { %344 = vmatprep.subr.bf16.mxu0 %v1121_v22  ;;  %v1175_v13 = vld [vmem:[#allocation5 + $0xe0] ss:$8 sps:$4 sm:$0xff]   ;;  %v1180_v14 = vld [vmem:[#allocation5 + $0xf4] ss:$8 sps:$4 sm:$0xff]   ;;  %v1178_v15 = vld [vmem:[#allocation5 + $0xf0] ss:$8 sps:$4 sm:$0xff]  }
  0x5e   :  { %v1181_v16 = vld [vmem:[#allocation7 + $0x40] sm:$0xff]   ;;  %v1183_v18 = vld [vmem:[#allocation7 + $0x48] sm:$0xff]   ;;  %v1185_v20 = vld [vmem:[#allocation7 + $0x50] sm:$0xff]   ;;  %s1335_s25 = smov [#allocation10]  }
  0x5f   :  { %592 = vmatpush1.bf16.msra.mxu1 %v1136_v34  ;;  %v1182_v17 = vld [vmem:[#allocation7] sm:$0xff]   ;;  %v1184_v19 = vld [vmem:[#allocation7 + $0x8] sm:$0xff]   ;;  %v1186_v21 = vld [vmem:[#allocation7 + $0x10] sm:$0xff]   ;;  %s936_s27 = sshll.u32 %s1335_s25, 4  ;;  %s937_s27 = int_to_ptr.vmem [resolvable:$true] %s936_s27 }
  0x60   :  { %345 = vmatpush1.bf16.msra.mxu0 %v1123_v23  ;;  %593 = vmatprep.subr.bf16.mxu1 %v1141_v35  ;;  %v1187_v22 = vld [vmem:[#allocation7 + $0x58] sm:$0xff]   ;;  %v244_v30 = vld [vmem:[%s1537_s6] sm:$0x3]  ;;  %p1298_p5 = scmp.lt.s32.totalorder %s937_s27, %s937_s27 }
  0x61   :  { %346 = vmatprep.subr.bf16.mxu0 %v1124_v24  ;;  %v1188_v23 = vld [vmem:[#allocation7 + $0x18] sm:$0xff]   ;;  %v1189_v24 = vld [vmem:[#allocation7 + $0x60] sm:$0xff]  }
  0x63   :  { %594 = vmatpush1.bf16.msra.mxu1 %v1139_v36 }
  0x64   :  { %347 = vmatpush1.bf16.msra.mxu0 %v1126_v25  ;;  %595 = vmatprep.subr.bf16.mxu1 %v1144_v37  ;;  %v1190_v25 = vld [vmem:[#allocation7 + $0x20] sm:$0xff]  }
  0x65   :  { %348 = vmatprep.subr.bf16.mxu0 %v1127_v26  ;;  %v1191_v26 = vld [vmem:[#allocation7 + $0x68] sm:$0xff]  }
  0x67   :  { %596 = vmatpush1.bf16.msra.mxu1 %v1142_v38 }
  0x68   :  { %349 = vmatpush1.bf16.msra.mxu0 %v1129_v27  ;;  %597 = vmatprep.subr.bf16.mxu1 %v1147_v39  ;;  %v246_v27 = vlaneseq }
  0x69   :  { %350 = vmatprep.subr.bf16.mxu0 %v1130_v28 }
  0x6a   :  { %v247_v28 = vshrl.u32 %v246_v27, 7 }
  0x6b   :  { %598 = vmatpush1.bf16.msra.mxu1 %v1145_v40 }
  0x6c   :  { %351 = vmatpush1.bf16.msra.mxu0 %v1132_v29  ;;  %599 = vmatprep.subr.bf16.mxu1 %v1150_v41  ;;  %v248_v29 = vsub.s32 0, %v247_v28  ;;  %v252_v31 = vsub.s32 1, %v247_v28 }
  0x6d   :  { %1032 = vmatprep.subr.bf16.mxu0 %v1181_v16  ;;  %v1002_v16 = vld [vmem:[%s1541_s10] ss:$0 sm:$0xff]  ;;  %s1293_s10 = scalar_lea.vmem %s937_s27, 256 }
  0x6e   :  { %v249_v32 = vrot.slane %v244_v30, %v248_v29  ;;  %v253_v33 = vrot.slane %v244_v30, %v252_v31  ;;  %p1294_p4 = scmp.ne.s32.totalorder %s937_s27, %s1293_s10  ;;  %p1299_p6 = scmp.lt.s32.totalorder %s1293_s10, %s1293_s10 }
  0x6f   :  { %600 = vmatpush1.bf16.msra.mxu1 %v1148_v42 }
  0x70   :  { %601 = vmatprep.subr.bf16.mxu1 %v1153_v43  ;;  %p1300_p7 = por %p1299_p6, %p1298_p5 }
  0x72   :  { %p1301_p8 = pnand %p1300_p7, %p1294_p4 }
  0x73   :  { %602 = vmatpush1.bf16.msra.mxu1 %v1151_v44 }
  0x74   :  { %603 = vmatprep.subr.bf16.mxu1 %v1156_v45 }
  0x77   :  { %604 = vmatpush1.bf16.msra.mxu1 %v1154_v46 }
  0x78   :  { %605 = vmatprep.subr.bf16.mxu1 %v1159_v47 }
  0x7b   :  { %606 = vmatpush1.bf16.msra.mxu1 %v1157_v48  ;;  %v1192_v48 = vld [vmem:[#allocation7 + $0x28] sm:$0xff]  }
  0x7c   :  { %607 = vmatprep.subr.bf16.mxu1 %v1162_v49  ;;  %v1193_v49 = vld [vmem:[#allocation7 + $0x70] sm:$0xff]  }
  0x7f   :  { %608 = vmatpush1.bf16.msra.mxu1 %v1160_v50  ;;  %v1194_v50 = vld [vmem:[#allocation7 + $0x30] sm:$0xff]  }
  0x80   :  { %609 = vmatprep.subr.bf16.mxu1 %v1165_v51  ;;  %v1195_v51 = vld [vmem:[#allocation7 + $0x78] sm:$0xff]  }
  0x83   :  { %610 = vmatpush1.bf16.msra.mxu1 %v1163_v52  ;;  %v1196_v52 = vld [vmem:[#allocation7 + $0x38] sm:$0xff]  }
  0x84   :  { %611 = vmatprep.subr.bf16.mxu1 %v1168_v53  ;;  %v417_v53 = vld [vmem:[%s1539_s8] sm:$0x3] }
  0x87   :  { %612 = vmatpush1.bf16.msra.mxu1 %v1166_v54  ;;  %v422_v54 = vrot.slane %v417_v53, %v248_v29 }
  0x88   :  { %613 = vmatprep.subr.bf16.mxu1 %v1171_v55  ;;  %v426_v55 = vrot.slane %v417_v53, %v252_v31 }
  0x8b   :  { %614 = vmatpush1.bf16.msra.mxu1 %v1169_v56 }
  0x8c   :  { %615 = vmatprep.subr.bf16.mxu1 %v1174_v57 }
  0x8f   :  { %616 = vmatpush1.bf16.msra.mxu1 %v1172_v58 }
  0x90   :  { %617 = vmatprep.subr.bf16.mxu1 %v1177_v12  ;;  %v1202_v12 = vld [vmem:[#allocation8 + $0x28] sm:$0xff]  }
  0x93   :  { %618 = vmatpush1.bf16.msra.mxu1 %v1175_v13  ;;  %v1203_v13 = vld [vmem:[#allocation8 + $0x30] sm:$0xff]  }
  0x94   :  { %619 = vmatprep.subr.bf16.mxu1 %v1180_v14  ;;  %v1204_v14 = vld [vmem:[#allocation8 + $0x38] sm:$0xff]  }
  0x97   :  { %620 = vmatpush1.bf16.msra.mxu1 %v1178_v15 }
 0x125   :  { %v155_v59 = vpop.f32.mrb[0].mxu1 }
 0x126   :  { %v1067_v60 = vpop.f32.mrb[1].mxu1 }
 0x127   :  { %v158_v61 = vpop.f32.mrb[2].mxu1 }
 0x128   :  { %v1068_v62 = vpop.f32.mrb[3].mxu1 }
 0x12d   :  { %v209_v63 = vpop.f32.mrb[4].mxu1 }
 0x12e   :  { %v210_v2 = vadd.f32 %v209_v63, %v155_v59  ;;  %v1073_v3 = vpop.f32.mrb[5].mxu1 }
 0x12f   :  { %v212_v4 = vpop.f32.mrb[6].mxu1 }
 0x130   :  { %v223_v5 = vadd.f32 %v953_v1, %v210_v2  ;;  %v213_v6 = vadd.f32 %v212_v4, %v158_v61  ;;  %v1074_v7 = vpop.f32.mrb[7].mxu1 }
 0x131   :  { %v1197_v7 = vld [vmem:[#allocation8] sm:$0xff]  }
 0x132   :  { %v224_v8 = vadd.f32 %v953_v1, %v213_v6  ;;  %v225_v9 = vmax.f32 %v223_v5, 0.0 }
 0x134   :  { %v226_v10 = vmax.f32 %v224_v8, 0.0  ;;  %v1198_v8 = vld [vmem:[#allocation8 + $0x8] sm:$0xff]  }
 0x136   :  { %v227_v11 = vpack.c.bf16 %v226_v10, %v225_v9  ;;  %v1199_v9 = vld [vmem:[#allocation8 + $0x10] sm:$0xff]   ;;  %v1200_v10 = vld [vmem:[#allocation8 + $0x18] sm:$0xff]  }
 0x138   :  { %369 = vmatmul.mubr.bf16.vlgmr.msra.gmra.mrb[0].mxu0 %v227_v11  ;;  %v1201_v11 = vld [vmem:[#allocation8 + $0x20] sm:$0xff]  }
 0x139   :  { %1033 = vmatpush3.bf16.msra.mxu0 %v1182_v17 }
 0x13a   :  { %1034 = vmatprep.subr.bf16.mxu0 %v1183_v18 }
 0x13d   :  { %1035 = vmatpush3.bf16.msra.mxu0 %v1184_v19 }
 0x13e   :  { %1036 = vmatprep.subr.bf16.mxu0 %v1185_v20 }
 0x141   :  { %1037 = vmatpush3.bf16.msra.mxu0 %v1186_v21 }
 0x142   :  { %1038 = vmatprep.subr.bf16.mxu0 %v1187_v22 }
 0x145   :  { %1039 = vmatpush3.bf16.msra.mxu0 %v1188_v23 }
 0x146   :  { %1040 = vmatprep.subr.bf16.mxu0 %v1189_v24 }
 0x149   :  { %1041 = vmatpush3.bf16.msra.mxu0 %v1190_v25 }
 0x14a   :  { %1042 = vmatprep.subr.bf16.mxu0 %v1191_v26 }
 0x14d   :  { %1043 = vmatpush3.bf16.msra.mxu0 %v1192_v48 }
 0x14e   :  { %1044 = vmatprep.subr.bf16.mxu0 %v1193_v49 }
 0x151   :  { %1045 = vmatpush3.bf16.msra.mxu0 %v1194_v50 }
 0x152   :  { %1046 = vmatprep.subr.bf16.mxu0 %v1195_v51 }
 0x155   :  { %1047 = vmatpush3.bf16.msra.mxu0 %v1196_v52 }
 0x156   :  { %1075 = vmatprep.subr.bf16.mxu0 %v1331_v0 }
 0x20b   :  { %v370_v34 = vpop.f32.mrb[0].mxu0 }
 0x20c   :  { %v371_v35 = vadd.f32 %v370_v34, %v249_v32  ;;  %v372_v36 = vpop.f32.mrb[1].mxu0 }
 0x20d   :  { %v373_v37 = vadd.f32 %v372_v36, %v253_v33  ;;  %v374_v38 = vpop.f32.mrb[2].mxu0 }
 0x20e   :  { %v375_v39 = vadd.f32 %v374_v38, %v249_v32  ;;  %v376_v40 = vpop.f32.mrb[3].mxu0  ;;  %v379_v42 = vmax.f32 %v371_v35, 0.0 }
 0x20f   :  { %v377_v41 = vadd.f32 %v376_v40, %v253_v33  ;;  %v380_v44 = vmax.f32 %v373_v37, 0.0 }
 0x210   :  { %v381_v43 = vmax.f32 %v375_v39, 0.0 }
 0x211   :  { %v382_v45 = vmax.f32 %v377_v41, 0.0 }
 0x212   :  { %v383_v46 = vpack.c.bf16 %v381_v43, %v379_v42 }
 0x213   :  { %v384_v47 = vpack.c.bf16 %v382_v45, %v380_v44 }
 0x215   :  { %621 = vmatprep.mubr.bf16.mxu1 %v384_v47 }
 0x216   :  { %622 = vmatmul.mubr.bf16.vlgmr.msra.gmra.mrb[8].mxu1 %v383_v46 }
 0x2e9   :  { %v623_v56 = vpop.f32.mrb[8].mxu1 }
 0x2ea   :  { %v624_v57 = vadd.f32 %v623_v56, %v422_v54  ;;  %v625_v58 = vpop.f32.mrb[9].mxu1 }
 0x2eb   :  { %v626_v59 = vadd.f32 %v625_v58, %v426_v55  ;;  %v627_v60 = vpop.f32.mrb[10].mxu1 }
 0x2ec   :  { %v628_v61 = vadd.f32 %v627_v60, %v422_v54  ;;  %v629_v62 = vpop.f32.mrb[11].mxu1  ;;  %v632_v1 = vmax.f32 %v624_v57, 0.0 }
 0x2ed   :  { %v630_v63 = vadd.f32 %v629_v62, %v426_v55  ;;  %v633_v3 = vmax.f32 %v626_v59, 0.0 }
 0x2ee   :  { %v634_v2 = vmax.f32 %v628_v61, 0.0 }
 0x2ef   :  { %v635_v4 = vmax.f32 %v630_v63, 0.0 }
 0x2f0   :  { %v636_v5 = vpack.c.bf16 %v634_v2, %v632_v1 }
 0x2f1   :  { %v637_v6 = vpack.c.bf16 %v635_v4, %v633_v3 }
 0x2f3   :  { %805 = vmatprep.mubr.bf16.mxu0 %v637_v6 }
 0x2f4   :  { %806 = vmatmul.mubr.bf16.vlgmr.msra.gmra.mrb[4].mxu0 %v636_v5 }
 0x2f5   :  { %1076 = vmatpush3.bf16.msra.mxu0 %v1197_v7  ;;  %1091 = vmatprep.mubr.msk.bf16.mxu0 %vm1333_vm2, %v1331_v0 }
 0x2f6   :  { %1077 = vmatprep.subr.bf16.mxu0 %v1331_v0 }
 0x2f9   :  { %1078 = vmatpush3.bf16.msra.mxu0 %v1198_v8 }
 0x2fa   :  { %1079 = vmatprep.subr.bf16.mxu0 %v1331_v0 }
 0x2fd   :  { %1080 = vmatpush3.bf16.msra.mxu0 %v1199_v9 }
 0x2fe   :  { %1081 = vmatprep.subr.bf16.mxu0 %v1331_v0 }
 0x301   :  { %1082 = vmatpush3.bf16.msra.mxu0 %v1200_v10 }
 0x302   :  { %1083 = vmatprep.subr.bf16.mxu0 %v1331_v0 }
 0x305   :  { %1084 = vmatpush3.bf16.msra.mxu0 %v1201_v11 }
 0x306   :  { %1085 = vmatprep.subr.bf16.mxu0 %v1331_v0 }
 0x309   :  { %1086 = vmatpush3.bf16.msra.mxu0 %v1202_v12 }
 0x30a   :  { %1087 = vmatprep.subr.bf16.mxu0 %v1331_v0 }
 0x30d   :  { %1088 = vmatpush3.bf16.msra.mxu0 %v1203_v13 }
 0x30e   :  { %1089 = vmatprep.subr.bf16.mxu0 %v1331_v0  ;;  %v1019_v0 = vld [vmem:[%s1543_s12] ss:$0 sm:$0xff] }
 0x311   :  { %1090 = vmatpush3.bf16.msra.mxu0 %v1204_v14 }
 0x3c7   :  { %v1048_v15 = vpop.f32.mrb[4].mxu0 }
 0x3c8   :  { %v1049_v17 = vpop.f32.mrb[5].mxu0 }
 0x3c9   :  { %v1050_v18 = vadd.f32 %v1049_v17, %v1048_v15  ;;  %v1051_v19 = vpop.f32.mrb[6].mxu0 }
 0x3ca   :  { %v1052_v20 = vpop.f32.mrb[7].mxu0 }
 0x3cb   :  { %v808_v21 = vadd.f32 %v1050_v18, %v1002_v16  ;;  %v1053_v22 = vadd.f32 %v1052_v20, %v1051_v19 }
 0x3cd   :  { %v811_v23 = vadd.f32 %v1053_v22, %v1002_v16  ;;  %v814_v24 = vmax.f32 %v808_v21, 0.0 }
 0x3cf   :  { %v815_v25 = vmax.f32 %v811_v23, 0.0 }
 0x3d1   :  { %v816_v26 = vpack.c.bf16 %v815_v25, %v814_v24 }
 0x3d3   :  { %1092 = vmatmul.mubr.bf16.vlgmr.msra.gmra.mrb[8].mxu0 %v816_v26 }
 0x4a6   :  { %v922_v27 = vpop.f32.mrb[8].mxu0 }
 0x4a7   :  { %v923_v28 = vadd.f32 %v1019_v0, %v922_v27  ;;  %v1093_v29 = vpop.f32.mrb[9].mxu0 }
 0x4a8   :  { %v925_v30 = vpop.f32.mrb[10].mxu0 }
 0x4a9   :  { %929 = vst [vmem:[#allocation10] sm:$0xff] %v923_v28  ;;  %v926_v31 = vadd.f32 %v1019_v0, %v925_v30  ;;  %v1094_v32 = vpop.f32.mrb[11].mxu0 }
 0x4ab   :  { %930 = vst [vmem:[#allocation10 + $0x8] sm:$0xff] %v926_v31 }
 0x4ac   :  { %1304 = shalt.err (!%p1301_p8)
}
 0x4ad   :  { %s1305_s18 = scalar_lea.hbm %s1544_s13, 256 }
 0x4ae   :  { %p1306_p9 = scmp.ne.s32.totalorder %s1544_s13, %s1305_s18  ;;  %p1309_p10 = scmp.lt.u32.totalorder %s1305_s18, %s1544_s13 }
 0x4b0   :  { %p1311_p11 = pnand %p1309_p10, %p1306_p9 }
 0x4b2   :  { %1314 = shalt.err (!%p1311_p11)
}
 0x4b3   :  { %942 = dma.vmem_to_hbm [thread:$0]  %s937_s27, 256, %s1544_s13, [#allocation4], %s1325_s20, %s1325_s20, %s1326_s21  }
 0x4b4   :  { %1321 = dma.done.wait [#allocation4], 256  }
 0x4b5   :  { %1322 = vsyncadd [#allocation4], 4294967040 }
 0x4b6   :  { %946 = vsyncpa [#allocation3], 1 }
 0x4b7   :  { %947 = vsyncpa [#allocation6], 1 }
 0x4b8   :  { %948 = vsyncpa [#allocation9], 1 }
 0x4b9   :  { %949 = vsyncpa [#allocation4], 1 }

</bundles_post_ra>
